<compile_context>
chip_gen: v7x
topology: tpu7x:2x2x1
jax: 0.10.0
libtpu: 0.0.40
codegen_flags: <defaults>
</compile_context>

<pallas_src>
import jax
import jax.numpy as jnp
from jax.experimental import pallas as pl
from jax.experimental.pallas import tpu as pltpu


MXU_DTYPE = jnp.bfloat16  # matmul-input dtype (accumulation stays f32)


def _round_up(x, m):
    return ((x + m - 1) // m) * m


def prepare_attention_params(w1, b1, w2, b2, w3, mxu_dtype=MXU_DTYPE):
    """One-time parameter prep (do NOT redo per decode step).

    Inputs follow PyTorch nn.Linear layout: w1 (P, E), b1 (P,), w2 (P, D),
    b2 (P,), w3 (1, P).  Returns (w1t, w2t, b, w3r) with weights transposed to
    (in, out), biases folded into a single (1, Pp) row, the projected dim
    zero-padded to a multiple of 128 lanes, and matmul weights cast to bf16.
    """
    P, E = w1.shape
    Pp = max(128, _round_up(P, 128))

    def pad_cols(a):
        return jnp.pad(a, ((0, 0), (0, Pp - P)))

    w1t = pad_cols(jnp.asarray(w1, jnp.float32).T).astype(mxu_dtype)      # (E, Pp)
    w2t = pad_cols(jnp.asarray(w2, jnp.float32).T).astype(mxu_dtype)      # (D, Pp)
    b = pad_cols((jnp.asarray(b1, jnp.float32)
                  + jnp.asarray(b2, jnp.float32)).reshape(1, P))          # (1, Pp) f32
    w3r = pad_cols(jnp.asarray(w3, jnp.float32).reshape(1, P))            # (1, Pp) f32
    return w1t, w2t, b, w3r


def attention_kernel(out_e_ref, h_ref, w1t_ref, w2t_ref, b_ref, w3_ref, a_ref):
    BB, T, E = out_e_ref.shape
    Pp = w1t_ref.shape[1]

    # Cast to bf16 in VMEM (inputs arrive in the caller's dtype -> one HBM read).
    # reshape (BB, T, E) -> (BB*T, E) is layout-free when T % 8 == 0.
    x = out_e_ref[...].astype(MXU_DTYPE).reshape(BB * T, E)
    hb = h_ref[...].astype(MXU_DTYPE)

    # linear1 over all BB*T frame rows as one MXU matmul, f32 accumulation.
    p1 = jnp.dot(x, w1t_ref[...], preferred_element_type=jnp.float32)     # (BB*T, Pp)
    # linear2 over the BB decoder states as one batched GEMM.
    p2 = jnp.dot(hb, w2t_ref[...], preferred_element_type=jnp.float32)    # (BB, Pp)

    # Folded bias b = b1 + b2; tanh stays f32 (EUP).
    t = jnp.tanh(p1.reshape(BB, T, Pp) + (p2 + b_ref[...])[:, None, :])   # (BB, T, Pp)

    # linear3 (no bias) as VPU multiply + lane reduce -> scores (BB, T).
    s = jnp.sum(t * w3_ref[...][None, :, :], axis=-1)                     # (BB, T)

    # Softmax over frames (last / lane axis).  Exact divide (approx reciprocal
    # was not accurate enough for the correctness tolerance).
    m = jnp.max(s, axis=-1, keepdims=True)
    e = jnp.exp(s - m)
    denom = jnp.sum(e, axis=-1, keepdims=True)
    a_ref[...] = (e / denom).astype(a_ref.dtype)


def _vmem_capacity_bytes():
    try:
        return int(pltpu.get_tpu_info().vmem_capacity_bytes)
    except Exception:
        return 64 * 1024 * 1024  # conservative (v7x per-TC VMEM)


def _vmem_estimate(bb, T, E, D, Pp, act_bytes):
    """Per-step VMEM bytes: double-buffered I/O blocks, in-kernel bf16 copies,
    the f32 (bb*T, Pp) intermediates (p1 and the tanh result), and
    double-buffered resident weights."""
    act_in = 2 * bb * (T * E + D) * act_bytes
    act_out = 2 * bb * T * 4
    casts = bb * (T * E + D) * 2
    inter = 2 * bb * T * Pp * 4
    weights = 2 * ((E + D) * Pp * 2 + 2 * Pp * 4)
    return act_in + act_out + casts + inter + weights


def _pick_bb(B, T, E, D, Pp, act_bytes, vmem_budget):
    """Pick the batch-rows-per-step BB.

    Candidates are multiples of 8 that divide B (so there is no batch padding
    and the (BB, D)/(BB, T) sublane dim stays 8-aligned), plus B itself (a
    block equal to the full dim is always legal).  Prefer >= 2 grid steps when
    a proper divisor exists (v7x has 2 TensorCores and pipelining needs >1
    step), then take the largest candidate whose out_e block is around the
    ~2 MiB tile-scaling sweet spot and whose total VMEM estimate (including
    the f32 intermediates) fits the budget.
    """
    cands = sorted({d for d in range(8, B + 1, 8) if B % d == 0} | {B})
    pool = [c for c in cands if c < B] or cands
    target_rows = max(pool[0], (2 << 20) // max(T * E * act_bytes, 1))
    for c in sorted(pool, reverse=True):
        if c <= target_rows and _vmem_estimate(c, T, E, D, Pp, act_bytes) <= vmem_budget:
            return c
    return pool[0]


def attention_layer(out_e, h, params):
    """out_e: (B, T, E), h: (B, D), params from prepare_attention_params()."""
    w1t, w2t, b, w3r = params
    B, T, E = out_e.shape
    D = h.shape[1]
    Pp = w1t.shape[1]
    assert h.shape[0] == B

    act_bytes = jnp.dtype(out_e.dtype).itemsize

    # VMEM budget with headroom: ~48 MiB on v7x (64 MiB physical), up to
    # ~96 MiB on v5e/v6e (128 MiB physical).
    cap = _vmem_capacity_bytes()
    vmem_budget = min(max(cap - (16 << 20), 16 << 20), 96 << 20)

    BB = _pick_bb(B, T, E, D, Pp, act_bytes, vmem_budget)
    grid = B // BB

    need = _vmem_estimate(BB, T, E, D, Pp, act_bytes)
    vmem_limit = int(min(vmem_budget, max(32 << 20, 2 * need)))

    out = pl.pallas_call(
        attention_kernel,
        out_shape=jax.ShapeDtypeStruct((B, T), jnp.float32),
        grid_spec=pltpu.PrefetchScalarGridSpec(
            num_scalar_prefetch=0,
            grid=(grid,),
            in_specs=[
                pl.BlockSpec((BB, T, E), lambda i: (i, 0, 0)),   # out_e (caller dtype)
                pl.BlockSpec((BB, D), lambda i: (i, 0)),         # h     (caller dtype)
                pl.BlockSpec((E, Pp), lambda i: (0, 0)),         # w1^T  (bf16)
                pl.BlockSpec((D, Pp), lambda i: (0, 0)),         # w2^T  (bf16)
                pl.BlockSpec((1, Pp), lambda i: (0, 0)),         # b1+b2 (f32)
                pl.BlockSpec((1, Pp), lambda i: (0, 0)),         # w3    (f32)
            ],
            out_specs=pl.BlockSpec((BB, T), lambda i: (i, 0)),
        ),
        compiler_params=pltpu.CompilerParams(
            dimension_semantics=("parallel",),
            vmem_limit_bytes=vmem_limit),
    )(out_e, h, w1t, w2t, b, w3r)

    return out


def reference(out_e, h, w1, b1, w2, b2, w3, mxu_dtype=jnp.float32):
    """Pure-JAX reference; optionally quantize the matmul inputs like the kernel."""
    oe = jnp.asarray(out_e, mxu_dtype)
    hh = jnp.asarray(h, mxu_dtype)
    w1c = jnp.asarray(w1, mxu_dtype)
    w2c = jnp.asarray(w2, mxu_dtype)
    p1 = jnp.einsum("bte,pe->btp", oe, w1c,
                    preferred_element_type=jnp.float32) + jnp.asarray(b1, jnp.float32)
    p2 = jnp.einsum("bd,pd->bp", hh, w2c,
                    preferred_element_type=jnp.float32) + jnp.asarray(b2, jnp.float32)
    x = jnp.tanh(p1 + p2[:, None, :])
    s = jnp.einsum("btp,p->bt", x, jnp.asarray(w3, jnp.float32)[0])
    return jax.nn.softmax(s, axis=1)


if __name__ == "__main__":
    B, T = 2, 8
    hidden_dim_en, hidden_dim_de, projected_size = 32, 32, 32

    key = jax.random.PRNGKey(0)
    k = jax.random.split(key, 7)
    out_e = jax.random.normal(k[0], (B, T, hidden_dim_en), jnp.float32)
    h = jax.random.normal(k[1], (B, hidden_dim_de), jnp.float32)

    # Deterministic params (shapes follow nn.Linear: (out, in)).
    w1 = jax.random.normal(k[2], (projected_size, hidden_dim_en), jnp.float32) * 0.1
    b1 = jax.random.normal(k[3], (projected_size,), jnp.float32) * 0.1
    w2 = jax.random.normal(k[4], (projected_size, hidden_dim_de), jnp.float32) * 0.1
    b2 = jax.random.normal(k[5], (projected_size,), jnp.float32) * 0.1
    w3 = jax.random.normal(k[6], (1, projected_size), jnp.float32) * 0.1

    params = prepare_attention_params(w1, b1, w2, b2, w3)   # one-time prep
    a = attention_layer(out_e, h, params)
    jax.block_until_ready(a)

    assert a.shape == (B, T)

    # Reference with identical bf16 matmul-input quantization.
    a_ref_bf16 = reference(out_e, h, w1, b1, w2, b2, w3, mxu_dtype=MXU_DTYPE)
    assert jnp.allclose(a, a_ref_bf16, atol=1e-3, rtol=1e-3), \
        float(jnp.max(jnp.abs(a - a_ref_bf16)))

    # Sanity vs full-f32 reference (only bf16 matmul-input quantization differs).
    a_ref_f32 = reference(out_e, h, w1, b1, w2, b2, w3, mxu_dtype=jnp.float32)
    assert jnp.allclose(a, a_ref_f32, atol=2e-2), \
        float(jnp.max(jnp.abs(a - a_ref_f32)))

    # Rows are exactly normalized (exact divide in the kernel softmax).
    assert jnp.allclose(jnp.sum(a, axis=1), jnp.ones((B,)), atol=1e-4)

    print("KERNEL_OK")
</pallas_src>

<mosaic_0001>
module attributes {stable_mosaic.version = 11 : i64} {
  func.func @attention_kernel(%arg0: i32, %arg1: memref<2x8x32xf32, #tpu.memory_space<vmem>>, %arg2: memref<2x32xf32, #tpu.memory_space<vmem>>, %arg3: memref<32x128xbf16, #tpu.memory_space<vmem>>, %arg4: memref<32x128xbf16, #tpu.memory_space<vmem>>, %arg5: memref<1x128xf32, #tpu.memory_space<vmem>>, %arg6: memref<1x128xf32, #tpu.memory_space<vmem>>, %arg7: memref<2x8xf32, #tpu.memory_space<vmem>>) attributes {dimension_semantics = [#tpu.dimension_semantics<parallel>], iteration_bounds = array<i64: 1>, scalar_prefetch = 0 : i64, scratch_operands = 0 : i64, tpu.core_type = #tpu.core_type<tc>, window_params = [{transform_indices = @transform_0, window_bounds = array<i64: 2, 8, 32>}, {transform_indices = @transform_1, window_bounds = array<i64: 2, 32>}, {pipeline_mode = #tpu.pipeline_mode<synchronous>, transform_indices = @transform_2, window_bounds = array<i64: 32, 128>}, {pipeline_mode = #tpu.pipeline_mode<synchronous>, transform_indices = @transform_3, window_bounds = array<i64: 32, 128>}, {pipeline_mode = #tpu.pipeline_mode<synchronous>, transform_indices = @transform_4, window_bounds = array<i64: 1, 128>}, {pipeline_mode = #tpu.pipeline_mode<synchronous>, transform_indices = @transform_5, window_bounds = array<i64: 1, 128>}, {transform_indices = @transform_6, window_bounds = array<i64: 2, 8>}]} {
    %c0 = arith.constant 0 : index
    %c0_0 = arith.constant 0 : index
    %c0_1 = arith.constant 0 : index
    %0 = vector.load %arg1[%c0, %c0_0, %c0_1] : memref<2x8x32xf32, #tpu.memory_space<vmem>>, vector<2x8x32xf32>
    %1 = arith.truncf %0 : vector<2x8x32xf32> to vector<2x8x32xbf16>
    %2 = vector.shape_cast %1 : vector<2x8x32xbf16> to vector<16x32xbf16>
    %c0_2 = arith.constant 0 : index
    %c0_3 = arith.constant 0 : index
    %3 = vector.load %arg2[%c0_2, %c0_3] : memref<2x32xf32, #tpu.memory_space<vmem>>, vector<2x32xf32>
    %4 = arith.truncf %3 : vector<2x32xf32> to vector<2x32xbf16>
    %c0_4 = arith.constant 0 : index
    %c0_5 = arith.constant 0 : index
    %5 = vector.load %arg3[%c0_4, %c0_5] : memref<32x128xbf16, #tpu.memory_space<vmem>>, vector<32x128xbf16>
    %cst = arith.constant dense<0.000000e+00> : vector<16x128xf32>
    %6 = tpu.matmul %2, %5, %cst {dimension_numbers = #tpu.dot_dimension_numbers<[1], [0], [0], [1], [0, 0, 1, 1], [], []>} : vector<16x32xbf16>, vector<32x128xbf16>, vector<16x128xf32> -> vector<16x128xf32>
    %c0_6 = arith.constant 0 : index
    %c0_7 = arith.constant 0 : index
    %7 = vector.load %arg4[%c0_6, %c0_7] : memref<32x128xbf16, #tpu.memory_space<vmem>>, vector<32x128xbf16>
    %cst_8 = arith.constant dense<0.000000e+00> : vector<2x128xf32>
    %8 = tpu.matmul %4, %7, %cst_8 {dimension_numbers = #tpu.dot_dimension_numbers<[1], [0], [0], [1], [0, 0, 1, 1], [], []>} : vector<2x32xbf16>, vector<32x128xbf16>, vector<2x128xf32> -> vector<2x128xf32>
    %9 = vector.shape_cast %6 : vector<16x128xf32> to vector<2x8x128xf32>
    %c0_9 = arith.constant 0 : index
    %c0_10 = arith.constant 0 : index
    %10 = vector.load %arg5[%c0_9, %c0_10] : memref<1x128xf32, #tpu.memory_space<vmem>>, vector<1x128xf32>
    %11 = vector.broadcast %10 : vector<1x128xf32> to vector<2x128xf32>
    %12 = arith.addf %8, %11 : vector<2x128xf32>
    %13 = vector.shape_cast %12 : vector<2x128xf32> to vector<2x1x128xf32>
    %14 = vector.broadcast %13 : vector<2x1x128xf32> to vector<2x8x128xf32>
    %15 = arith.addf %9, %14 : vector<2x8x128xf32>
    %16 = math.tanh %15 : vector<2x8x128xf32>
    %c0_11 = arith.constant 0 : index
    %c0_12 = arith.constant 0 : index
    %17 = vector.load %arg6[%c0_11, %c0_12] : memref<1x128xf32, #tpu.memory_space<vmem>>, vector<1x128xf32>
    %18 = vector.shape_cast %17 : vector<1x128xf32> to vector<1x1x128xf32>
    %19 = vector.broadcast %18 : vector<1x1x128xf32> to vector<2x8x128xf32>
    %20 = arith.mulf %16, %19 : vector<2x8x128xf32>
    %cst_13 = arith.constant dense<0.000000e+00> : vector<2x8xf32>
    %21 = vector.multi_reduction <add>, %20, %cst_13 [2] : vector<2x8x128xf32> to vector<2x8xf32>
    %cst_14 = arith.constant dense<0xFF800000> : vector<2xf32>
    %22 = vector.multi_reduction <maximumf>, %21, %cst_14 [1] : vector<2x8xf32> to vector<2xf32>
    %23 = vector.shape_cast %22 : vector<2xf32> to vector<2x1xf32>
    %24 = vector.broadcast %23 : vector<2x1xf32> to vector<2x8xf32>
    %25 = arith.subf %21, %24 : vector<2x8xf32>
    %26 = math.exp %25 : vector<2x8xf32>
    %cst_15 = arith.constant dense<0.000000e+00> : vector<2xf32>
    %27 = vector.multi_reduction <add>, %26, %cst_15 [1] : vector<2x8xf32> to vector<2xf32>
    %28 = vector.shape_cast %27 : vector<2xf32> to vector<2x1xf32>
    %29 = vector.broadcast %28 : vector<2x1xf32> to vector<2x8xf32>
    %30 = arith.divf %26, %29 : vector<2x8xf32>
    %c0_16 = arith.constant 0 : index
    %c0_17 = arith.constant 0 : index
    %31 = vector.load %arg7[%c0_16, %c0_17] : memref<2x8xf32, #tpu.memory_space<vmem>>, vector<2x8xf32>
    tpu.vector_store %arg7[%c0_16, %c0_17], %30 {strides = array<i32>} : memref<2x8xf32, #tpu.memory_space<vmem>>, vector<2x8xf32>,
    return
  }
  func.func @transform_0(%arg0: i32) -> (i32, i32, i32) {
    %c0_i32 = arith.constant 0 : i32
    %c0_i32_0 = arith.constant 0 : i32
    %c0_i32_1 = arith.constant 0 : i32
    return %arg0, %c0_i32, %c0_i32_0 : i32, i32, i32
  }
  func.func @transform_1(%arg0: i32) -> (i32, i32) {
    %c0_i32 = arith.constant 0 : i32
    %c0_i32_0 = arith.constant 0 : i32
    return %arg0, %c0_i32 : i32, i32
  }
  func.func @transform_2(%arg0: i32) -> (i32, i32) {
    %c0_i32 = arith.constant 0 : i32
    %c0_i32_0 = arith.constant 0 : i32
    %c0_i32_1 = arith.constant 0 : i32
    return %c0_i32, %c0_i32_0 : i32, i32
  }
  func.func @transform_3(%arg0: i32) -> (i32, i32) {
    %c0_i32 = arith.constant 0 : i32
    %c0_i32_0 = arith.constant 0 : i32
    %c0_i32_1 = arith.constant 0 : i32
    return %c0_i32, %c0_i32_0 : i32, i32
  }
  func.func @transform_4(%arg0: i32) -> (i32, i32) {
    %c0_i32 = arith.constant 0 : i32
    %c0_i32_0 = arith.constant 0 : i32
    %c0_i32_1 = arith.constant 0 : i32
    return %c0_i32, %c0_i32_0 : i32, i32
  }
  func.func @transform_5(%arg0: i32) -> (i32, i32) {
    %c0_i32 = arith.constant 0 : i32
    %c0_i32_0 = arith.constant 0 : i32
    %c0_i32_1 = arith.constant 0 : i32
    return %c0_i32, %c0_i32_0 : i32, i32
  }
  func.func @transform_6(%arg0: i32) -> (i32, i32) {
    %c0_i32 = arith.constant 0 : i32
    %c0_i32_0 = arith.constant 0 : i32
    return %arg0, %c0_i32 : i32, i32
  }
}

</mosaic_0001>

<bundles_post_ra>
// kernel: tpu_custom_call.1
= control target key start
LH: loop header
LB: loop body
LE: loop exit
PB: predicated region body
PF: predicated region fallthrough
CT: control target
= control target key end

     0   :  { %11 = vsyncpa [#allocation3], 0  ;;  %s639_s0 = inlined_call_operand.hbm [shape: f32[2,8,32], index: 0, kind: input, shape index: {}]   ;;  %s640_s1 = inlined_call_operand.vmem [shape: f32[2,32], index: 1, kind: input, shape index: {}]   ;;  %s641_s2 = inlined_call_operand.hbm [shape: bf16[32,128], index: 2, kind: input, shape index: {}]   ;;  %s642_s3 = inlined_call_operand.hbm [shape: bf16[32,128], index: 3, kind: input, shape index: {}]   ;;  %s643_s4 = inlined_call_operand.vmem [shape: f32[1,128], index: 4, kind: input, shape index: {}]   ;;  %s644_s5 = inlined_call_operand.vmem [shape: f32[1,128], index: 5, kind: input, shape index: {}]   ;;  %s645_s6 = inlined_call_operand.hbm [shape: f32[2,8], index: 6, kind: output, shape index: {}]  }
   0x1   :  { %12 = vsyncpa [#allocation6], 0 }
   0x2   :  { %13 = vsyncpa [#allocation4], 0  ;;  %s517_s21 = smov [#allocation5]   ;;  %s423_s25 = scalar_lea.hbm %s641_s2, 256 }
   0x3   :  { %s33_s22 = sshll.u32 %s517_s21, 4  ;;  %p424_p0 = scmp.ne.s32.totalorder %s641_s2, %s423_s25  ;;  %s34_s22 = int_to_ptr.vmem [resolvable:$true] %s33_s22 }
   0x4   :  { %p427_p1 = scmp.lt.u32.totalorder %s423_s25, %s641_s2 }
   0x6   :  { %p429_p2 = pnand %p427_p1, %p424_p0 }
   0x8   :  { %432 = shalt.err (!%p429_p2)
}
   0x9   :  { %s433_s30 = scalar_lea.vmem %s34_s22, 256  ;;  %p438_p4 = scmp.lt.s32.totalorder %s34_s22, %s34_s22 }
   0xa   :  { %p434_p3 = scmp.ne.s32.totalorder %s34_s22, %s433_s30  ;;  %p439_p5 = scmp.lt.s32.totalorder %s433_s30, %s433_s30 }
   0xc   :  { %p440_p6 = por %p439_p5, %p438_p4 }
   0xe   :  { %p441_p7 = pnand %p440_p6, %p434_p3 }
  0x10   :  { %444 = shalt.err (!%p441_p7)
}
  0x11   :  { %s518_s7 = smov 64   ;;  %s519_s8 = smov 4  }
  0x12   :  { %39 = dma.hbm_to_vmem [thread:$0]  %s641_s2, 256, %s34_s22, [#allocation6], %s518_s7, %s518_s7, %s519_s8  }
  0x13   :  { %s520_s11 = smov [#allocation2]   ;;  %s445_s15 = scalar_lea.hbm %s639_s0, 256 }
  0x14   :  { %s19_s12 = sshll.u32 %s520_s11, 4  ;;  %p446_p8 = scmp.ne.s32.totalorder %s639_s0, %s445_s15  ;;  %s20_s12 = int_to_ptr.vmem [resolvable:$true] %s19_s12 }
  0x15   :  { %p449_p9 = scmp.lt.u32.totalorder %s445_s15, %s639_s0 }
  0x17   :  { %p451_p10 = pnand %p449_p9, %p446_p8 }
  0x19   :  { %454 = shalt.err (!%p451_p10)
}
  0x1a   :  { %s455_s20 = scalar_lea.vmem %s20_s12, 256  ;;  %p460_p12 = scmp.lt.s32.totalorder %s20_s12, %s20_s12 }
  0x1b   :  { %p456_p11 = scmp.ne.s32.totalorder %s20_s12, %s455_s20  ;;  %p461_p13 = scmp.lt.s32.totalorder %s455_s20, %s455_s20 }
  0x1d   :  { %p462_p0 = por %p461_p13, %p460_p12 }
  0x1f   :  { %p463_p1 = pnand %p462_p0, %p456_p11 }
  0x21   :  { %466 = shalt.err (!%p463_p1)
}
  0x22   :  { %s521_s2 = smov 128   ;;  %s522_s21 = smov 8  }
  0x23   :  { %25 = dma.hbm_to_vmem [thread:$0]  %s639_s0, 256, %s20_s12, [#allocation3], %s521_s2, %s521_s2, %s522_s21  }
  0x24   :  { %s523_s24 = smov [#allocation7]   ;;  %s467_s28 = scalar_lea.hbm %s642_s3, 256 }
  0x25   :  { %s45_s25 = sshll.u32 %s523_s24, 4  ;;  %p468_p2 = scmp.ne.s32.totalorder %s642_s3, %s467_s28  ;;  %s46_s25 = int_to_ptr.vmem [resolvable:$true] %s45_s25 }
  0x26   :  { %p471_p3 = scmp.lt.u32.totalorder %s467_s28, %s642_s3 }
  0x28   :  { %p473_p4 = pnand %p471_p3, %p468_p2 }
  0x2a   :  { %476 = shalt.err (!%p473_p4)
}
  0x2b   :  { %s477_s11 = scalar_lea.vmem %s46_s25, 256  ;;  %p482_p6 = scmp.lt.s32.totalorder %s46_s25, %s46_s25 }
  0x2c   :  { %p478_p5 = scmp.ne.s32.totalorder %s46_s25, %s477_s11  ;;  %p483_p7 = scmp.lt.s32.totalorder %s477_s11, %s477_s11 }
  0x2e   :  { %p484_p8 = por %p483_p7, %p482_p6 }
  0x30   :  { %p485_p9 = pnand %p484_p8, %p478_p5 }
  0x32   :  { %488 = shalt.err (!%p485_p9)
}
  0x33   :  { %51 = dma.hbm_to_vmem [thread:$0]  %s642_s3, 256, %s46_s25, [#allocation6], %s518_s7, %s518_s7, %s519_s8  }
  0x34   :  { %511 = dma.done.wait [#allocation3], 256  }
  0x35   :  { %512 = vsyncadd [#allocation3], 4294967040 }
  0x36   :  { %513 = dma.done.wait [#allocation6], 512  }
  0x37   :  { %514 = vsyncadd [#allocation6], 4294966784  ;;  %v524_v0 = vmov 0.0   ;;  %vm525_vm0 = vmmov 0   ;;  %v407_v1 = vld [vmem:[#allocation7] sm:$0xff]   ;;  %v408_v2 = vld [vmem:[#allocation7 + $0x8] sm:$0xff]   ;;  %v208_v12 = vlaneseq }
  0x38   :  { %385 = vmatprep.subr.bf16.mxu1 %v524_v0  ;;  %377 = vmatprep.subr.bf16.mxu0 %v524_v0  ;;  %v409_v3 = vld [vmem:[#allocation5] sm:$0xff]   ;;  %v70_v4 = vld [vmem:[%s640_s1] sm:$0x3]  ;;  %v410_v5 = vld [vmem:[#allocation5 + $0x8] sm:$0xff]   ;;  %vm93_vm1 = vcmask 261120   ;;  %vm266_vm2 = vcmask 1041409  }
  0x39   :  { %389 = vmatprep.mubr.msk.bf16.mxu1 %vm525_vm0, %v524_v0  ;;  %381 = vmatprep.mubr.msk.bf16.mxu0 %vm525_vm0, %v524_v0  ;;  %v66_v6 = vld [vmem:[#allocation2] sm:$0xff]  ;;  %v67_v7 = vld [vmem:[#allocation2 + $0x8] sm:$0xff]  ;;  %v71_v8 = vpack.c.bf16 %v70_v4, %v70_v4  ;;  %v526_v10 = vmov 1966171168   ;;  %v609_v14 = vshrl.u32 %v208_v12, 7  ;;  %v257_v40 = vand.u32 127, %v208_v12 }
  0x3a   :  { %386 = vmatpush3.bf16.msra.mxu1 %v407_v1  ;;  %378 = vmatpush3.bf16.msra.mxu0 %v409_v3  ;;  %v370_v9 = vpack.c.bf16 %v67_v7, %v66_v6  ;;  %v206_v11 = vunpack.c.l.s4 %v526_v10  ;;  %v365_v15 = vld [vmem:[%s643_s4] ss:$0 sm:$0xff]  ;;  %vm269_vm3 = vcmask 58368   ;;  %v527_v48 = vmov 0  }
  0x3b   :  { %387 = vmatprep.subr.bf16.mxu1 %v524_v0  ;;  %379 = vmatprep.subr.bf16.mxu0 %v524_v0  ;;  %v229_v24 = vsub.s32 0, %v609_v14  ;;  %v369_v35 = vld [vmem:[%s644_s5] ss:$0 sm:$0xff]  ;;  %v260_v42 = vsub.s32 %v257_v40, %v609_v14  ;;  %v280_v49 = vsub.s32 1, %v609_v14  ;;  %s528_s5 = smov [#allocation8]  }
  0x3c   :  { %v207_v13 = vunpack.c.0.s8 %v206_v11  ;;  %406 = vset.pattern.permute.xlu0 %v527_v48  ;;  %405 = vset.pattern.permute.xlu1 %v527_v48  ;;  %s351_s8 = sshll.u32 %s528_s5, 4  ;;  %s352_s8 = int_to_ptr.vmem [resolvable:$true] %s351_s8 }
  0x3d   :  { %s489_s15 = scalar_lea.vmem %s352_s8, 32  ;;  %p494_p11 = scmp.lt.s32.totalorder %s352_s8, %s352_s8 }
  0x3e   :  { %388 = vmatpush3.bf16.msra.mxu1 %v408_v2  ;;  %380 = vmatpush3.bf16.msra.mxu0 %v410_v5  ;;  %v210_v16 = vsub.s32 %v207_v13, %v609_v14  ;;  %p490_p10 = scmp.ne.s32.totalorder %s352_s8, %s489_s15  ;;  %p495_p12 = scmp.lt.s32.totalorder %s489_s15, %s489_s15 }
  0x40   :  { %p496_p13 = por %p495_p12, %p494_p11 }
  0x41   :  { %390 = vmatmul.mubr.msk.bf16.vlgmr.msra.gmra.mrb[0].mxu1 %vm93_vm1, %v71_v8  ;;  %382 = vmatmul.mubr.msk.bf16.vlgmr.msra.gmra.mrb[0].mxu0 %vm93_vm1, %v370_v9 }
  0x42   :  { %p497_p0 = pnand %p496_p13, %p490_p10 }
 0x114   :  { %v198_v17 = vpop.f32.mrb[0].mxu1  ;;  %v131_v21 = vpop.f32.mrb[0].mxu0 }
 0x115   :  { %v199_v18 = vadd.f32 %v365_v15, %v198_v17  ;;  %v391_v19 = vpop.f32.mrb[1].mxu1  ;;  %v383_v25 = vpop.f32.mrb[1].mxu0 }
 0x116   :  { %v201_v20 = vpop.f32.mrb[2].mxu1  ;;  %v134_v26 = vpop.f32.mrb[2].mxu0 }
 0x117   :  { %v211_v22 = vrot.slane %v199_v18, %v210_v16  ;;  %v392_v23 = vpop.f32.mrb[3].mxu1  ;;  %v384_v29 = vpop.f32.mrb[3].mxu0 }
 0x119   :  { %v212_v27 = vcombine.high %v211_v22, %v211_v22  ;;  %v219_v28 = vrot.slane %v211_v22, %v210_v16 }
 0x11b   :  { %v230_v30 = vrot.slane %v219_v28, %v229_v24  ;;  %v226_v31 = vrot.slane %v212_v27, %v210_v16 }
 0x11d   :  { %v237_v32 = vadd.f32 %v230_v30, %v131_v21  ;;  %v234_v33 = vrot.slane %v226_v31, %v229_v24 }
 0x11f   :  { %411 = vtanh.f32 %v237_v32  ;;  %v238_v34 = vadd.f32 %v234_v33, %v134_v26 }
 0x121   :  { %413 = vtanh.f32 %v238_v34 }
 0x129   :  { %v412_v36 = vpop.eup %411 }
 0x12a   :  { %v248_v37 = vmul.f32 %v412_v36, %v369_v35 }
 0x12b   :  { %v414_v38 = vpop.eup %413 }
 0x12c   :  { %250 = vadd.xlane.f32.xlu0 %v248_v37  ;;  %v249_v39 = vmul.f32 %v414_v38, %v369_v35 }
 0x130   :  { %252 = vadd.xlane.f32.xlu0 %v249_v39 }
 0x1b9   :  { %v251_v41 = vpop.xlane.xlu0 %250 }
 0x1ba   :  { %v261_v44 = vrot.slane %v251_v41, %v260_v42 }
 0x1bd   :  { %v253_v43 = vpop.xlane.xlu0 %252 }
 0x1be   :  { %v265_v45 = vrot.slane %v253_v43, %v260_v42 }
 0x1c0   :  { %v267_v46 = vsel %vm266_vm2, %v265_v45, %v261_v44 }
 0x1c1   :  { %v270_v47 = vsel %vm269_vm3, %v267_v46, -inf }
 0x1c2   :  { %271 = vmax.xlane.f32.xlu1 %v270_v47 }
 0x24f   :  { %v272_v50 = vpop.xlane.xlu1 %271 }
 0x250   :  { %v277_v51 = vrot.slane %v272_v50, %v229_v24  ;;  %v281_v52 = vrot.slane %v272_v50, %v280_v49 }
 0x252   :  { %v284_v53 = vsub.f32 %v251_v41, %v277_v51  ;;  %v285_v54 = vsub.f32 %v253_v43, %v281_v52 }
 0x254   :  { %v286_v55 = vmul.f32 1.442695, %v284_v53  ;;  %v288_v56 = vmul.f32 1.442695, %v285_v54 }
 0x256   :  { %415 = vpow2.f32 %v286_v55 }
 0x257   :  { %417 = vpow2.f32 %v288_v56 }
 0x260   :  { %v416_v57 = vpop.eup %415 }
 0x261   :  { %v418_v58 = vpop.eup %417  ;;  %293 = vperm.xlu1 %405, %v416_v57  }
 0x262   :  { %296 = vperm.xlu0 %406, %v418_v58  }
 0x2e0   :  { %v294_v59 = vpop.permute.xlu1 %293 }
 0x2e1   :  { %v297_v60 = vpop.permute.xlu0 %296  ;;  %v301_v61 = vrot.slane %v294_v59, %v260_v42 }
 0x2e2   :  { %v305_v62 = vrot.slane %v297_v60, %v260_v42 }
 0x2e4   :  { %v306_v63 = vsel %vm266_vm2, %v305_v62, %v301_v61 }
 0x2e5   :  { %v308_v0 = vsel %vm269_vm3, %v306_v63, 0.0 }
 0x2e6   :  { %309 = vadd.xlane.f32.xlu1 %v308_v0 }
 0x373   :  { %v310_v1 = vpop.xlane.xlu1 %309 }
 0x374   :  { %v315_v2 = vrot.slane %v310_v1, %v229_v24  ;;  %v319_v3 = vrot.slane %v310_v1, %v280_v49 }
 0x376   :  { %419 = vrcp.f32 %v315_v2 }
 0x377   :  { %421 = vrcp.f32 %v319_v3 }
 0x380   :  { %v420_v4 = vpop.eup %419 }
 0x381   :  { %v323_v5 = vmul.f32 %v420_v4, %v416_v57  ;;  %v422_v6 = vpop.eup %421 }
 0x382   :  { %v325_v7 = vmul.f32 %v422_v6, %v418_v58 }
 0x383   :  { %329 = vperm.xlu0 %406, %v323_v5  }
 0x387   :  { %332 = vperm.xlu0 %406, %v325_v7  }
 0x402   :  { %v330_v8 = vpop.permute.xlu0 %329 }
 0x403   :  { %v337_v10 = vrot.slane %v330_v8, %v260_v42 }
 0x406   :  { %v333_v9 = vpop.permute.xlu0 %332 }
 0x407   :  { %v341_v11 = vrot.slane %v333_v9, %v260_v42 }
 0x409   :  { %v342_v12 = vsel %vm266_vm2, %v341_v11, %v337_v10 }
 0x40a   :  { %344 = vst.msk [vmem:[#allocation8] sm:$0x3] %vm269_vm3, %v342_v12 }
 0x40b   :  { %500 = shalt.err (!%p497_p0)
}
 0x40c   :  { %s501_s18 = scalar_lea.hbm %s645_s6, 32 }
 0x40d   :  { %p502_p1 = scmp.ne.s32.totalorder %s645_s6, %s501_s18  ;;  %p505_p2 = scmp.lt.u32.totalorder %s501_s18, %s645_s6 }
 0x40f   :  { %p507_p3 = pnand %p505_p2, %p502_p1 }
 0x411   :  { %510 = shalt.err (!%p507_p3)
}
 0x412   :  { %354 = dma.vmem_to_hbm [thread:$0]  %s352_s8, 32, %s645_s6, [#allocation4]  }
 0x413   :  { %515 = dma.done.wait [#allocation4], 32  }
 0x414   :  { %516 = vsyncadd [#allocation4], 4294967264 }
 0x415   :  { %358 = vsyncpa [#allocation3], 1 }
 0x416   :  { %359 = vsyncpa [#allocation6], 1 }
 0x417   :  { %360 = vsyncpa [#allocation4], 1 }

</bundles_post_ra>
